<compile_context>
chip_gen: v7x
topology: tpu7x:2x2x1
jax: 0.10.0
libtpu: 0.0.40
codegen_flags: <defaults>
</compile_context>

<pallas_src>
import jax
import jax.numpy as jnp
from jax.experimental import pallas as pl
from jax.experimental.pallas import tpu as pltpu


def _make_kernel(total_hw: int, hw_tile: int, bt: int, rows_per: int, rem: int):
    """Kernel factory closing over static sizes.

    rem = number of valid lanes in the LAST hw tile (== hw_tile when hw_tile
    divides hw; smaller otherwise -> ragged tile masked in-kernel).
    """
    inv_hw = 1.0 / float(total_hw)
    ragged = rem != hw_tile  # static

    def kernel(x_ref, mask_ref, w1t_ref, w2t_ref, o_ref, sum_acc, max_acc, stk):
        # x_ref   : (bt, c, hw_tile)  input dtype (f32 or bf16)
        # mask_ref: (bt, c) f32       stochastic-pool channel-selection mask
        # w1t_ref : (c, hid) f32      conv1 weight, transposed
        # w2t_ref : (hid, c) f32      conv2 weight, transposed
        # o_ref   : (bt, c) f32
        # sum_acc/max_acc: (bt, c) f32 scratch accumulators
        # stk     : (3*rows_per, c) f32 scratch for the batched MLP operand
        k = pl.program_id(1)
        last = pl.num_programs(1) - 1

        @pl.when(k == 0)
        def _init():
            sum_acc[...] = jnp.zeros_like(sum_acc)
            max_acc[...] = jnp.full_like(max_acc, -jnp.inf)

        def _accumulate(x_sum, x_max):
            # Sum: f32 accumulation fused into the reduce (no full-tile f32
            # copy kept around for the max path).  Max: native dtype (bf16 is
            # VPU-packed on v6e/v7x); only the tiny (bt, c) partial is upcast.
            # (v7x option: the sum could be pushed onto the MXU with a ones
            #  contraction if VALU ever binds; at ~2 ops/elem it does not.)
            sum_acc[...] += jnp.sum(x_sum, axis=-1, dtype=jnp.float32)
            max_acc[...] = jnp.maximum(
                max_acc[...], jnp.max(x_max, axis=-1).astype(jnp.float32))

        if not ragged:
            x = x_ref[...]
            _accumulate(x, x)
        else:
            @pl.when(k < last)
            def _full_tile():
                x = x_ref[...]
                _accumulate(x, x)

            @pl.when(k == last)
            def _ragged_tile():
                # Final partial tile: lanes >= rem hold undefined padding.
                x = x_ref[...]
                lane = jax.lax.broadcasted_iota(jnp.int32, x.shape, 2)
                valid = lane < rem
                _accumulate(jnp.where(valid, x, jnp.zeros_like(x)),
                            jnp.where(valid, x, jnp.full_like(x, -jnp.inf)))

        @pl.when(k == last)
        def _finalize():
            avg = sum_acc[...] * inv_hw          # adaptive_avg_pool2d -> 1x1
            mx = max_acc[...]                    # adaptive_max_pool2d -> 1x1
            sto = avg * mask_ref[...]            # GlobalStochasticPooling == masked avg

            # Batch the three MLP branches: stack into a sublane-aligned
            # (3*rows_per, c) operand so the shared MLP is 2 matmuls, not 6.
            stk[...] = jnp.zeros_like(stk)
            stk[0:bt, :] = avg
            stk[rows_per:rows_per + bt, :] = mx
            stk[2 * rows_per:2 * rows_per + bt, :] = sto

            h = jnp.dot(stk[...], w1t_ref[...],
                        preferred_element_type=jnp.float32)      # (3*rows_per, hid)
            h = jnp.maximum(h, 0.0)                               # ReLU
            y = jnp.dot(h, w2t_ref[...],
                        preferred_element_type=jnp.float32)      # (3*rows_per, c)

            s = (y[0:bt]
                 + y[rows_per:rows_per + bt]
                 + y[2 * rows_per:2 * rows_per + bt])
            o_ref[...] = jax.nn.sigmoid(s)

    return kernel


def _pick_hw_tile(hw, b_tile, c, itemsize, *,
                  target_lanes=1024,
                  x_window_bytes=16 * 1024 * 1024,
                  num_buffers=2):
    """Lane tile for the hw axis.

    Targets 512-1024 lanes (measured 85%+ of HBM roofline vs ~29% at 128),
    does NOT require hw % tile == 0 (the ragged last tile is masked in-kernel)
    and never falls back to a full-hw block, so the double-buffered x window
    stays within budget (conservative for v7x's 64 MiB physical VMEM)."""
    if hw <= 128:
        return hw                                     # single full-dim block
    per_lane = num_buffers * b_tile * c * itemsize    # bytes/lane, all buffers
    cap = (x_window_bytes // max(per_lane, 1)) // 128 * 128
    cap = max(cap, 128)                               # never below one lane tile
    tile = min(target_lanes, cap, (hw // 128) * 128)
    return max(tile, 128)


def multiscale_channel_attention(x, w1, w2, mask, *, hw_tile=None,
                                 target_lanes=1024,
                                 x_window_bytes=16 * 1024 * 1024):
    """x: (b,c,h,w) f32/bf16 (bf16 recommended: halves HBM traffic);
    w1: (hid,c); w2: (c,hid); mask: (b,c) stochastic-pool channel mask.
    Returns sigmoid channel attention of shape (b, c, 1, 1) in f32.

    target_lanes / x_window_bytes: v6e (128 MiB VMEM) callers may raise these
    (e.g. 2048 / 24 MiB) for a small extra win; keep defaults on v7x (64 MiB).
    """
    b, c, h, w = x.shape
    hw = h * w
    hid = w1.shape[0]

    # Keep x in its native dtype (no wrapper-side upcast -> no extra HBM pass).
    x_flat = x.reshape(b, c, hw)
    w1t = jnp.transpose(w1).astype(jnp.float32)   # (c, hid)
    w2t = jnp.transpose(w2).astype(jnp.float32)   # (hid, c)
    mask = mask.astype(jnp.float32)

    # b tiling: 8-row blocks whenever b > 8 -> >=2 "parallel" blocks feed both
    # v7x TensorCores for b >= 9; odd batches never inflate the x tile since
    # the ragged last b-block is handled by Pallas edge-block masking (its
    # garbage rows are never written back).  b <= 8 uses a single full-b block.
    # TODO(synk): for b <= 8 on v7x (2 TCs) grid[0] == 1 leaves one core idle;
    # splitting the hw reduction into two "parallel" partial accumulators plus
    # a tiny combine would recover it (structural change, v7x-only benefit).
    b_tile = b if b <= 8 else 8
    rows_per = 8                                  # sublane-aligned stacking pitch
    grid_b = pl.cdiv(b, b_tile)

    itemsize = jnp.dtype(x_flat.dtype).itemsize
    if hw_tile is None:
        hw_tile = _pick_hw_tile(hw, b_tile, c, itemsize,
                                target_lanes=target_lanes,
                                x_window_bytes=x_window_bytes)
    assert hw_tile <= hw and (hw_tile % 128 == 0 or hw_tile == hw), (
        f"hw_tile={hw_tile} must be <= hw={hw} and a multiple of 128 (or == hw)")

    n_hw = pl.cdiv(hw, hw_tile)
    rem = hw - (n_hw - 1) * hw_tile               # valid lanes in the last tile

    grid = (grid_b, n_hw)
    kernel = _make_kernel(hw, hw_tile, b_tile, rows_per, rem)

    x_map = lambda i, k: (i, 0, k)
    # Small-tile regimes are per-step-overhead bound: ask for a 3rd buffer.
    if hw_tile <= 256 and n_hw >= 3 and hasattr(pl, "Buffered"):
        x_spec = pl.BlockSpec((b_tile, c, hw_tile), x_map,
                              pipeline_mode=pl.Buffered(3))
        num_buffers = 3
    else:
        x_spec = pl.BlockSpec((b_tile, c, hw_tile), x_map)
        num_buffers = 2

    # Scoped-VMEM limit from actual usage: covers v5e's 16 MiB default scope,
    # stays comfortably under v7x's 64 MiB physical ceiling.
    x_window = num_buffers * b_tile * c * hw_tile * itemsize
    vmem_limit = int(min(max(32 * 1024 * 1024, x_window + 8 * 1024 * 1024),
                         56 * 1024 * 1024))

    out = pl.pallas_call(
        kernel,
        out_shape=jax.ShapeDtypeStruct((b, c), jnp.float32),
        grid_spec=pltpu.PrefetchScalarGridSpec(
            num_scalar_prefetch=0,
            grid=grid,
            in_specs=[
                # x: tiled over (b, hw); pipelined (double/triple-buffered).
                x_spec,
                # mask / weights: constant index over k -> fetched once, resident.
                pl.BlockSpec((b_tile, c), lambda i, k: (i, 0)),
                pl.BlockSpec((c, hid), lambda i, k: (0, 0)),
                pl.BlockSpec((hid, c), lambda i, k: (0, 0)),
            ],
            out_specs=pl.BlockSpec((b_tile, c), lambda i, k: (i, 0)),
            scratch_shapes=[
                pltpu.VMEM((b_tile, c), jnp.float32),        # running sum
                pltpu.VMEM((b_tile, c), jnp.float32),        # running max
                pltpu.VMEM((3 * rows_per, c), jnp.float32),  # stacked MLP operand
            ],
        ),
        compiler_params=pltpu.CompilerParams(
            dimension_semantics=("parallel", "arbitrary"),
            vmem_limit_bytes=vmem_limit,
        ),
    )(x_flat, mask, w1t, w2t)
    return out.reshape(b, c, 1, 1)


def stochastic_mask(key, b, c, num_segments=4):
    # Replicates GlobalStochasticPooling's sampling: p normalises to uniform
    # over channels, so idx ~ Multinomial(num_segments, uniform(c)) counts.
    # A channel contributes its avg pool unless ALL num_segments draws hit it.
    # TODO(synk): torch.distributions.Multinomial has no in-kernel equivalent;
    # sampling is done here in plain JAX (deterministic key) and passed as a mask.
    logits = jnp.zeros((b, num_segments, c), jnp.float32)
    draws = jax.random.categorical(key, logits, axis=-1)                   # (b, num_segments)
    counts = jnp.sum(jax.nn.one_hot(draws, c, dtype=jnp.float32), axis=1)  # (b, c)
    return (counts < num_segments).astype(jnp.float32)


if __name__ == "__main__":
    key = jax.random.PRNGKey(0)
    k_x, k_w1, k_w2, k_sto, k_x3 = jax.random.split(key, 5)

    b, c, h, w = 2, 64, 16, 16
    ratio = 16
    hid = c // ratio  # 4

    x = jax.random.normal(k_x, (b, c, h, w), jnp.float32)
    # Conv2d(c, c//ratio, 1, bias=False) weight (hid, c, 1, 1) squeezed to (hid, c)
    w1 = jax.random.normal(k_w1, (hid, c), jnp.float32) * (1.0 / jnp.sqrt(c))
    # Conv2d(c//ratio, c, 1, bias=False) weight (c, hid, 1, 1) squeezed to (c, hid)
    w2 = jax.random.normal(k_w2, (c, hid), jnp.float32) * (1.0 / jnp.sqrt(hid))

    def ref_fn(xr, mk):
        bb, cc = xr.shape[:2]
        xf = xr.reshape(bb, cc, -1).astype(jnp.float32)
        avg = xf.mean(-1)
        mx = xf.max(-1)
        sto = avg * mk

        def mlp_ref(v):
            return jnp.maximum(v @ w1.T, 0.0) @ w2.T

        return jax.nn.sigmoid(mlp_ref(avg) + mlp_ref(mx) + mlp_ref(sto)
                              ).reshape(bb, cc, 1, 1)

    mask = stochastic_mask(k_sto, b, c, num_segments=4)

    # Case 1: f32, forced hw_tile=128 so the multi-step accumulator pipeline is
    # exercised even at this tiny spatial size (hw=256 -> 2 grid steps).
    out = multiscale_channel_attention(x, w1, w2, mask, hw_tile=128)
    jax.block_until_ready(out)
    assert out.shape == (b, c, 1, 1)
    assert jnp.allclose(out, ref_fn(x, mask), atol=1e-4, rtol=1e-4), "f32 mismatch"

    # Case 2: bf16 activations (recommended default; halves HBM traffic),
    # auto-picked tile; accumulation / MLP stay in f32.
    x_bf16 = x.astype(jnp.bfloat16)
    out_bf = multiscale_channel_attention(x_bf16, w1, w2, mask)
    jax.block_until_ready(out_bf)
    assert jnp.allclose(out_bf, ref_fn(x_bf16, mask), atol=1e-4, rtol=1e-4), "bf16 mismatch"

    # Case 3: ragged everything — hw=324 (tile 256 + masked 68-lane remainder)
    # and b=10 (two "parallel" 8-row b-blocks, last one ragged).
    b3, h3, w3 = 10, 18, 18
    x3 = jax.random.normal(k_x3, (b3, c, h3, w3), jnp.float32)
    mask3 = stochastic_mask(k_sto, b3, c, num_segments=4)
    out3 = multiscale_channel_attention(x3, w1, w2, mask3)
    jax.block_until_ready(out3)
    assert out3.shape == (b3, c, 1, 1)
    assert jnp.allclose(out3, ref_fn(x3, mask3), atol=1e-4, rtol=1e-4), "ragged mismatch"

    print("KERNEL_OK")
</pallas_src>

<mosaic_0001>
module attributes {stable_mosaic.version = 11 : i64} {
  func.func @kernel(%arg0: i32, %arg1: i32, %arg2: memref<2x64x128xf32, #tpu.memory_space<vmem>>, %arg3: memref<2x64xf32, #tpu.memory_space<vmem>>, %arg4: memref<64x4xf32, #tpu.memory_space<vmem>>, %arg5: memref<4x64xf32, #tpu.memory_space<vmem>>, %arg6: memref<2x64xf32, #tpu.memory_space<vmem>>, %arg7: memref<2x64xf32, #tpu.memory_space<vmem>>, %arg8: memref<2x64xf32, #tpu.memory_space<vmem>>, %arg9: memref<24x64xf32, #tpu.memory_space<vmem>>) attributes {dimension_semantics = [#tpu.dimension_semantics<parallel>, #tpu.dimension_semantics<arbitrary>], iteration_bounds = array<i64: 1, 2>, scalar_prefetch = 0 : i64, scratch_operands = 3 : i64, tpu.core_type = #tpu.core_type<tc>, window_params = [{transform_indices = @transform_0, window_bounds = array<i64: 2, 64, 128>}, {transform_indices = @transform_1, window_bounds = array<i64: 2, 64>}, {pipeline_mode = #tpu.pipeline_mode<synchronous>, transform_indices = @transform_2, window_bounds = array<i64: 64, 4>}, {pipeline_mode = #tpu.pipeline_mode<synchronous>, transform_indices = @transform_3, window_bounds = array<i64: 4, 64>}, {transform_indices = @transform_4, window_bounds = array<i64: 2, 64>}]} {
    %c0_i32 = arith.constant 0 : i32
    %0 = arith.cmpi eq, %arg1, %c0_i32 : i32
    %1 = arith.extui %0 : i1 to i32
    %c0_i32_0 = arith.constant 0 : i32
    %2 = arith.cmpi ne, %1, %c0_i32_0 : i32
    scf.if %2 {
      %cst_13 = arith.constant 0.000000e+00 : f32
      %15 = vector.broadcast %cst_13 : f32 to vector<2x64xf32>
      %c0_14 = arith.constant 0 : index
      %c0_15 = arith.constant 0 : index
      %16 = vector.load %arg7[%c0_14, %c0_15] : memref<2x64xf32, #tpu.memory_space<vmem>>, vector<2x64xf32>
      tpu.vector_store %arg7[%c0_14, %c0_15], %15 {strides = array<i32>} : memref<2x64xf32, #tpu.memory_space<vmem>>, vector<2x64xf32>,
      %cst_16 = arith.constant 0xFF800000 : f32
      %17 = vector.broadcast %cst_16 : f32 to vector<2x64xf32>
      %c0_17 = arith.constant 0 : index
      %c0_18 = arith.constant 0 : index
      %18 = vector.load %arg8[%c0_17, %c0_18] : memref<2x64xf32, #tpu.memory_space<vmem>>, vector<2x64xf32>
      tpu.vector_store %arg8[%c0_17, %c0_18], %17 {strides = array<i32>} : memref<2x64xf32, #tpu.memory_space<vmem>>, vector<2x64xf32>,
    } else {
    }
    %c0 = arith.constant 0 : index
    %c0_1 = arith.constant 0 : index
    %c0_2 = arith.constant 0 : index
    %3 = vector.load %arg2[%c0, %c0_1, %c0_2] : memref<2x64x128xf32, #tpu.memory_space<vmem>>, vector<2x64x128xf32>
    %c0_3 = arith.constant 0 : index
    %c0_4 = arith.constant 0 : index
    %4 = vector.load %arg7[%c0_3, %c0_4] : memref<2x64xf32, #tpu.memory_space<vmem>>, vector<2x64xf32>
    %cst = arith.constant dense<0.000000e+00> : vector<2x64xf32>
    %5 = vector.multi_reduction <add>, %3, %cst [2] : vector<2x64x128xf32> to vector<2x64xf32>
    %6 = arith.addf %4, %5 : vector<2x64xf32>
    %c0_5 = arith.constant 0 : index
    %c0_6 = arith.constant 0 : index
    %7 = vector.load %arg7[%c0_5, %c0_6] : memref<2x64xf32, #tpu.memory_space<vmem>>, vector<2x64xf32>
    tpu.vector_store %arg7[%c0_5, %c0_6], %6 {strides = array<i32>} : memref<2x64xf32, #tpu.memory_space<vmem>>, vector<2x64xf32>,
    %c0_7 = arith.constant 0 : index
    %c0_8 = arith.constant 0 : index
    %8 = vector.load %arg8[%c0_7, %c0_8] : memref<2x64xf32, #tpu.memory_space<vmem>>, vector<2x64xf32>
    %cst_9 = arith.constant dense<0xFF800000> : vector<2x64xf32>
    %9 = vector.multi_reduction <maximumf>, %3, %cst_9 [2] : vector<2x64x128xf32> to vector<2x64xf32>
    %10 = arith.maximumf %8, %9 : vector<2x64xf32>
    %c0_10 = arith.constant 0 : index
    %c0_11 = arith.constant 0 : index
    %11 = vector.load %arg8[%c0_10, %c0_11] : memref<2x64xf32, #tpu.memory_space<vmem>>, vector<2x64xf32>
    tpu.vector_store %arg8[%c0_10, %c0_11], %10 {strides = array<i32>} : memref<2x64xf32, #tpu.memory_space<vmem>>, vector<2x64xf32>,
    %c1_i32 = arith.constant 1 : i32
    %12 = arith.cmpi eq, %arg1, %c1_i32 : i32
    %13 = arith.extui %12 : i1 to i32
    %c0_i32_12 = arith.constant 0 : i32
    %14 = arith.cmpi ne, %13, %c0_i32_12 : i32
    scf.if %14 {
      %c0_13 = arith.constant 0 : index
      %c0_14 = arith.constant 0 : index
      %15 = vector.load %arg7[%c0_13, %c0_14] : memref<2x64xf32, #tpu.memory_space<vmem>>, vector<2x64xf32>
      %cst_15 = arith.constant 3.906250e-03 : f32
      %16 = vector.broadcast %cst_15 : f32 to vector<2x64xf32>
      %17 = arith.mulf %15, %16 : vector<2x64xf32>
      %c0_16 = arith.constant 0 : index
      %c0_17 = arith.constant 0 : index
      %18 = vector.load %arg8[%c0_16, %c0_17] : memref<2x64xf32, #tpu.memory_space<vmem>>, vector<2x64xf32>
      %c0_18 = arith.constant 0 : index
      %c0_19 = arith.constant 0 : index
      %19 = vector.load %arg3[%c0_18, %c0_19] : memref<2x64xf32, #tpu.memory_space<vmem>>, vector<2x64xf32>
      %20 = arith.mulf %17, %19 : vector<2x64xf32>
      %cst_20 = arith.constant 0.000000e+00 : f32
      %21 = vector.broadcast %cst_20 : f32 to vector<24x64xf32>
      %c0_21 = arith.constant 0 : index
      %c0_22 = arith.constant 0 : index
      %22 = vector.load %arg9[%c0_21, %c0_22] : memref<24x64xf32, #tpu.memory_space<vmem>>, vector<24x64xf32>
      tpu.vector_store %arg9[%c0_21, %c0_22], %21 {strides = array<i32>} : memref<24x64xf32, #tpu.memory_space<vmem>>, vector<24x64xf32>,
      %c0_23 = arith.constant 0 : index
      %c0_24 = arith.constant 0 : index
      %23 = vector.load %arg9[%c0_23, %c0_24] : memref<24x64xf32, #tpu.memory_space<vmem>>, vector<2x64xf32>
      tpu.vector_store %arg9[%c0_23, %c0_24], %17 {strides = array<i32>} : memref<24x64xf32, #tpu.memory_space<vmem>>, vector<2x64xf32>,
      %c8 = arith.constant 8 : index
      %c0_25 = arith.constant 0 : index
      %24 = vector.load %arg9[%c8, %c0_25] : memref<24x64xf32, #tpu.memory_space<vmem>>, vector<2x64xf32>
      tpu.vector_store %arg9[%c8, %c0_25], %18 {strides = array<i32>} : memref<24x64xf32, #tpu.memory_space<vmem>>, vector<2x64xf32>,
      %c16 = arith.constant 16 : index
      %c0_26 = arith.constant 0 : index
      %25 = vector.load %arg9[%c16, %c0_26] : memref<24x64xf32, #tpu.memory_space<vmem>>, vector<2x64xf32>
      tpu.vector_store %arg9[%c16, %c0_26], %20 {strides = array<i32>} : memref<24x64xf32, #tpu.memory_space<vmem>>, vector<2x64xf32>,
      %c0_27 = arith.constant 0 : index
      %c0_28 = arith.constant 0 : index
      %26 = vector.load %arg9[%c0_27, %c0_28] : memref<24x64xf32, #tpu.memory_space<vmem>>, vector<24x64xf32>
      %c0_29 = arith.constant 0 : index
      %c0_30 = arith.constant 0 : index
      %27 = vector.load %arg4[%c0_29, %c0_30] : memref<64x4xf32, #tpu.memory_space<vmem>>, vector<64x4xf32>
      %cst_31 = arith.constant dense<0.000000e+00> : vector<24x4xf32>
      %28 = tpu.matmul %26, %27, %cst_31 {dimension_numbers = #tpu.dot_dimension_numbers<[1], [0], [0], [1], [0, 0, 1, 1], [], []>} : vector<24x64xf32>, vector<64x4xf32>, vector<24x4xf32> -> vector<24x4xf32>
      %cst_32 = arith.constant 0.000000e+00 : f32
      %29 = vector.broadcast %cst_32 : f32 to vector<24x4xf32>
      %30 = arith.maximumf %28, %29 : vector<24x4xf32>
      %c0_33 = arith.constant 0 : index
      %c0_34 = arith.constant 0 : index
      %31 = vector.load %arg5[%c0_33, %c0_34] : memref<4x64xf32, #tpu.memory_space<vmem>>, vector<4x64xf32>
      %cst_35 = arith.constant dense<0.000000e+00> : vector<24x64xf32>
      %32 = tpu.matmul %30, %31, %cst_35 {dimension_numbers = #tpu.dot_dimension_numbers<[1], [0], [0], [1], [0, 0, 1, 1], [], []>} : vector<24x4xf32>, vector<4x64xf32>, vector<24x64xf32> -> vector<24x64xf32>
      %33 = vector.extract_strided_slice %32 {offsets = [0, 0], sizes = [2, 64], strides = [1, 1]} : vector<24x64xf32> to vector<2x64xf32>
      %34 = vector.extract_strided_slice %32 {offsets = [8, 0], sizes = [2, 64], strides = [1, 1]} : vector<24x64xf32> to vector<2x64xf32>
      %35 = arith.addf %33, %34 : vector<2x64xf32>
      %36 = vector.extract_strided_slice %32 {offsets = [16, 0], sizes = [2, 64], strides = [1, 1]} : vector<24x64xf32> to vector<2x64xf32>
      %37 = arith.addf %35, %36 : vector<2x64xf32>
      %38 = arith.negf %37 : vector<2x64xf32>
      %39 = math.exp %38 : vector<2x64xf32>
      %cst_36 = arith.constant 1.000000e+00 : f32
      %40 = vector.broadcast %cst_36 : f32 to vector<2x64xf32>
      %41 = arith.addf %40, %39 : vector<2x64xf32>
      %42 = arith.divf %40, %41 : vector<2x64xf32>
      %c0_37 = arith.constant 0 : index
      %c0_38 = arith.constant 0 : index
      %43 = vector.load %arg6[%c0_37, %c0_38] : memref<2x64xf32, #tpu.memory_space<vmem>>, vector<2x64xf32>
      tpu.vector_store %arg6[%c0_37, %c0_38], %42 {strides = array<i32>} : memref<2x64xf32, #tpu.memory_space<vmem>>, vector<2x64xf32>,
    } else {
    }
    return
  }
  func.func @transform_0(%arg0: i32, %arg1: i32) -> (i32, i32, i32) {
    %c0_i32 = arith.constant 0 : i32
    %c0_i32_0 = arith.constant 0 : i32
    return %arg0, %c0_i32, %arg1 : i32, i32, i32
  }
  func.func @transform_1(%arg0: i32, %arg1: i32) -> (i32, i32) {
    %c0_i32 = arith.constant 0 : i32
    %c0_i32_0 = arith.constant 0 : i32
    return %arg0, %c0_i32 : i32, i32
  }
  func.func @transform_2(%arg0: i32, %arg1: i32) -> (i32, i32) {
    %c0_i32 = arith.constant 0 : i32
    %c0_i32_0 = arith.constant 0 : i32
    %c0_i32_1 = arith.constant 0 : i32
    return %c0_i32, %c0_i32_0 : i32, i32
  }
  func.func @transform_3(%arg0: i32, %arg1: i32) -> (i32, i32) {
    %c0_i32 = arith.constant 0 : i32
    %c0_i32_0 = arith.constant 0 : i32
    %c0_i32_1 = arith.constant 0 : i32
    return %c0_i32, %c0_i32_0 : i32, i32
  }
  func.func @transform_4(%arg0: i32, %arg1: i32) -> (i32, i32) {
    %c0_i32 = arith.constant 0 : i32
    %c0_i32_0 = arith.constant 0 : i32
    return %arg0, %c0_i32 : i32, i32
  }
}

</mosaic_0001>

<bundles_post_ra>
// kernel: tpu_custom_call.1
= control target key start
LH: loop header
LB: loop body
LE: loop exit
PB: predicated region body
PF: predicated region fallthrough
CT: control target
= control target key end

     0   :  { %9 = vsyncpa [#allocation6], 0  ;;  %s1517_s0 = inlined_call_operand.hbm [shape: f32[2,64,256], index: 0, kind: input, shape index: {}]   ;;  %s1518_s1 = inlined_call_operand.vmem [shape: f32[2,64], index: 1, kind: input, shape index: {}]   ;;  %s1519_s2 = inlined_call_operand.vmem [shape: f32[64,4], index: 2, kind: input, shape index: {}]   ;;  %s1520_s3 = inlined_call_operand.vmem [shape: f32[4,64], index: 3, kind: input, shape index: {}]   ;;  %s1521_s4 = inlined_call_operand.hbm [shape: f32[2,64], index: 4, kind: output, shape index: {}]  }
   0x1   :  { %11 = vsyncpa [#allocation6 + $0x1], 0 }
   0x2   :  { %12 = vsyncpa [#allocation7], 0  ;;  %s1166_s15 = smov 0   ;;  %s1168_s16 = smov 0  }
   0x3   :  { %s1170_s17 = smov 0   ;;  %s1172_s18 = smov 0  }
   0x4   :  { %s1174_s19 = smov 0   ;;  %s1176_s20 = smov 0  }
   0x5 LB: > { %s856_s21 = sadd.s32 4294967295, %s1129_s20   ;;  %s27_s22 = sadd.s32 1, %s1125_s19  ;;  %s1129_s20 = sphi %s1176_s20, %s18_s20   ;;  %s1125_s19 = sphi %s1174_s19, %s1531_s19   ;;  %s1121_s18 = sphi %s1172_s18, %s1530_s18   ;;  %s1117_s17 = sphi %s1170_s17, %s1529_s17   ;;  %s1113_s16 = sphi %s1168_s16, %s1528_s16   ;;  %s1109_s15 = sphi %s1166_s15, %s1527_s15  }
   0x6   : > { %p28_p0 = scmp.ge.s32.totalorder %s27_s22, 2  ;;  %s39_s23 = sadd.s32 1, %s1117_s17 }
   0x7   : > { %p46_p1 = scmp.ne.s32.totalorder %s1117_s17, %s1113_s16  ;;  %p47_p2 = scmp.eq.s32.totalorder %s1129_s20, 0 }
   0x8   : > { %s1533_s22 = smov (%p28_p0, %s27_s22), 0  ;;  %p52_p4 = scmp.ne.s32.totalorder %s1113_s16, %s1109_s15 }
   0x9   : > { %p1202_p3 = por %p47_p2, %p46_p1  ;;  %s35_s25 = ssub.s32 %s1125_s19, %s1533_s22 }
   0xa   : > { %p53_p5 = scmp.eq.s32.totalorder %s856_s21, 0  ;;  %p37_p6 = scmp.eq.s32.totalorder %s35_s25, 0 }
   0xb   : > { %p955_p8 = scmp.lt.s32.totalorder %s1129_s20, 2  ;;  %s183_s28 = sand.u32 1, %s1117_s17  }
   0xc   : > { %p1211_p7 = por %p53_p5, %p52_p4  ;;  %s861_s29 = sshll.u32 %s1125_s19, 7 }
   0xd   : > { %s1217_s27 = scalar_select %p37_p6, %s1117_s17, %s39_s23  }
   0xe   : > { %s860_s30 = sshll.u32 %s183_s28, 7  ;;  %s1224_s7 = scalar_lea.hbm %s1517_s0, %s861_s29 }
   0xf   : > { %s187_s8 = scalar_lea.vmem [#allocation5], %s860_s30  ;;  %p1228_p9 = pnand %p955_p8, %p1202_p3 }
  0x10   : > { %s196_s9 = sshll.u32 %s187_s8, 4  ;;  %s1235_s11 = scalar_lea.sflag [#allocation6], %s183_s28  ;;  %s1232_s9 = int_to_ptr.vmem [resolvable:$true] %s196_s9 }
  0x11   : > { %s1019_s12 = scalar_lea.hbm %s1224_s7, 2048  ;;  %p1021_p12 = pneg %p1228_p9 }
  0x12   : > { %p1020_p11 = scmp.ne.s32.totalorder %s1224_s7, %s1019_s12  ;;  %s1024_s15 = scalar_lea.hbm %s1517_s0, 4096 }
  0x13   : > { %p1025_p1 = scmp.lt.u32.totalorder %s1224_s7, %s1517_s0  ;;  %p1026_p2 = scmp.lt.u32.totalorder %s1024_s15, %s1019_s12 }
  0x14   : > { %p1022_p13 = pnand %p1021_p12, %p1020_p11  ;;  %p1028_p4 = scmp.lt.u32.totalorder %s1019_s12, %s1224_s7 }
  0x15   : > { %p1027_p3 = por %p1026_p2, %p1025_p1 }
  0x16   : > { %p1023_p0 = pneg %p1022_p13 }
  0x17   : > { %p1029_p5 = por %p1028_p4, %p1027_p3 }
  0x19   : > { %p1030_p6 = pnand %p1029_p5, %p1023_p0 }
  0x1b   : > { %1033 = shalt.err (!%p1030_p6)
}
  0x1c   : > { %s1034_s25 = scalar_lea.vmem %s1232_s9, 2048  ;;  %s1131_s28 = smov [#allocation5]  }
  0x1d   : > { %p1035_p8 = scmp.ne.s32.totalorder %s1232_s9, %s1034_s25  ;;  %s1039_s29 = sshll.u32 %s1131_s28, 4  ;;  %s1040_s29 = int_to_ptr.vmem [resolvable:$false] %s1039_s29 }
  0x1e   : > { %s1041_s30 = scalar_lea.vmem %s1040_s29, 4096  ;;  %p1042_p10 = scmp.lt.s32.totalorder %s1232_s9, %s1040_s29 }
  0x1f   : > { %p1037_p11 = pnand %p1035_p8, %p1021_p12  ;;  %p1043_p1 = scmp.lt.s32.totalorder %s1041_s30, %s1034_s25 }
  0x21   : > { %p1038_p13 = pneg %p1037_p11  ;;  %p1044_p2 = por %p1043_p1, %p1042_p10 }
  0x23   : > { %p1045_p3 = pnand %p1044_p2, %p1038_p13 }
  0x25   : > { %1048 = shalt.err (!%p1045_p3)
}
  0x26   : > { %s1132_s5 = smov 256   ;;  %s1133_s6 = smov 128  }
  0x27   : > { %s1134_s8 = smov 8   ;;  %p204_p12 = scmp.lt.s32.totalorder %s1129_s20, 3 }
  0x28   : > { %954 = dma.hbm_to_vmem [thread:$0]  (!%p1228_p9), %s1224_s7, 2048, %s1232_s9, %s1235_s11, %s1132_s5, %s1133_s6, %s1134_s8  }
  0x29   : > { %p1525_p0 = scmp.ge.s32.totalorder %s1129_s20, 1 }
  0x2b   : > { %p205_p4 = pnand %p1525_p0, %p204_p12 }
  0x2c   : > { %s210_s12 = sand.u32 (!%p205_p4), 1, %s1113_s16  }
  0x2d   : > { %208 = sbr.rel (%p205_p4) target bundleno = 780 (0x30c), region = 36  ;;  %s863_s13 = sshll.u32 (!%p205_p4), %s210_s12, 7 }
  0x2e   : > { %s211_s14 = scalar_lea.sflag (!%p205_p4), [#allocation6], %s210_s12  ;;  %s1267_s15 = scalar_lea.vmem (!%p205_p4), [#allocation5], %s863_s13 }
  0x34   : > { %1100 = dma.done.wait (%p1211_p7), %s211_s14, 2048  }
  0x35   : > { %1102 = vsyncadd (%p1211_p7), %s211_s14, 4294965248  ;;  %p864_p10 = scmp.ne.s32.totalorder %s1121_s18, 0 }
  0x36   : > { %vm247_vm0 = vcmask (!%p864_p10), 517120   ;;  %v1135_v0 = vmov (!%p864_p10), 0.0   ;;  %v1136_v1 = vmov (!%p864_p10), -inf  }
  0x37   : > { %246 = sbr.rel (%p864_p10) target bundleno = 62 (0x3e), region = 44  ;;  %248 = vst.msk [vmem:[#allocation2] sm:$0x3] (!%p864_p10), %vm247_vm0, %v1135_v0  ;;  %249 = vst.msk [vmem:[#allocation3] sm:$0x3] (!%p864_p10), %vm247_vm0, %v1136_v1 }
  0x3e PF: > { %v258_v2 = vld [vmem:[%s1267_s15 + $0x40] sm:$0xff]  ;;  %v259_v4 = vld [vmem:[%s1267_s15 + $0x48] sm:$0xff]  ;;  %v260_v6 = vld [vmem:[%s1267_s15 + $0x50] sm:$0xff]  ;;  %v315_v34 = vlaneseq  ;;  %vm326_vm1 = vcmask 130112   ;;  %vm333_vm2 = vcmask 195712   ;;  %vm340_vm3 = vcmask 261312  }
  0x3f   : > { %v250_v3 = vld [vmem:[%s1267_s15] sm:$0xff]  ;;  %283 = vadd.xlane.f32.xlu1 %v258_v2  ;;  %v251_v5 = vld [vmem:[%s1267_s15 + $0x8] sm:$0xff]  ;;  %v252_v7 = vld [vmem:[%s1267_s15 + $0x10] sm:$0xff]  ;;  %vm347_vm4 = vcmask 326912   ;;  %vm354_vm5 = vcmask 392512   ;;  %vm361_vm6 = vcmask 458112  }
  0x40   : > { %267 = vadd.xlane.f32.xlu0 %v250_v3  ;;  %v261_v8 = vld [vmem:[%s1267_s15 + $0x58] sm:$0xff]  ;;  %v262_v10 = vld [vmem:[%s1267_s15 + $0x60] sm:$0xff]  ;;  %v263_v12 = vld [vmem:[%s1267_s15 + $0x68] sm:$0xff]  ;;  %v316_v37 = vand.u32 127, %v315_v34  ;;  %v318_v41 = vshrl.u32 %v315_v34, 7  ;;  %vm368_vm7 = vcmask 523712  }
  0x41   : > { %v253_v9 = vld [vmem:[%s1267_s15 + $0x18] sm:$0xff]  ;;  %v254_v11 = vld [vmem:[%s1267_s15 + $0x20] sm:$0xff]  ;;  %v255_v13 = vld [vmem:[%s1267_s15 + $0x28] sm:$0xff]  ;;  %vm409_vm8 = vcmask 1041409   ;;  %vm413_vm9 = vcmask 517120   ;;  %p865_p7 = scmp.ne.s32.totalorder %s1121_s18, 1 }
  0x42   : > { %v264_v14 = vld [vmem:[%s1267_s15 + $0x70] sm:$0xff]  ;;  %v265_v16 = vld [vmem:[%s1267_s15 + $0x78] sm:$0xff]  ;;  %v321_v40 = vadd.s32 4294967288, %v316_v37  ;;  %v328_v42 = vadd.s32 4294967280, %v316_v37  ;;  %v335_v45 = vadd.s32 4294967272, %v316_v37  ;;  %v342_v46 = vadd.s32 4294967264, %v316_v37 }
  0x43   : > { %285 = vadd.xlane.f32.xlu1 %v259_v4  ;;  %v256_v15 = vld [vmem:[%s1267_s15 + $0x30] sm:$0xff]  ;;  %v257_v17 = vld [vmem:[%s1267_s15 + $0x38] sm:$0xff]  ;;  %v349_v48 = vadd.s32 4294967256, %v316_v37  ;;  %v356_v49 = vadd.s32 4294967248, %v316_v37  ;;  %v363_v50 = vadd.s32 4294967240, %v316_v37  ;;  %v319_v51 = vsub.s32 %v316_v37, %v318_v41 }
  0x44   : > { %269 = vadd.xlane.f32.xlu0 %v251_v5  ;;  %v324_v47 = vsub.s32 %v321_v40, %v318_v41  ;;  %v331_v52 = vsub.s32 %v328_v42, %v318_v41  ;;  %v1338_v55 = vsub.s32 %v335_v45, %v318_v41  ;;  %v1340_v56 = vsub.s32 %v342_v46, %v318_v41 }
  0x45   : > { %v1343_v58 = vsub.s32 %v349_v48, %v318_v41  ;;  %v1345_v59 = vsub.s32 %v356_v49, %v318_v41  ;;  %v1350_v63 = vsub.s32 %v363_v50, %v318_v41  ;;  %v266_v49 = vld [vmem:[#allocation2] sm:$0x3]  ;;  %vm1138_vm10 = vmmov (!%p865_p7), 0  }
  0x46   : > { %vm555_vm11 = vcmask (!%p865_p7), 523264   ;;  %vm676_vm12 = vcmask (!%p865_p7), 1043456   ;;  %vm666_vm13 = vcmask (!%p865_p7), 31744  }
  0x47   : > { %418 = vmax.xlane.f32.xlu1 %v251_v5 }
  0x48   : > { %416 = vmax.xlane.f32.xlu0 %v250_v3 }
  0x4b   : > { %434 = vmax.xlane.f32.xlu1 %v259_v4 }
  0x4c   : > { %432 = vmax.xlane.f32.xlu0 %v258_v2 }
  0x4f   : > { %287 = vadd.xlane.f32.xlu1 %v260_v6 }
  0x50   : > { %271 = vadd.xlane.f32.xlu0 %v252_v7 }
  0x53   : > { %436 = vmax.xlane.f32.xlu1 %v260_v6 }
  0x54   : > { %420 = vmax.xlane.f32.xlu0 %v252_v7 }
  0x57   : > { %289 = vadd.xlane.f32.xlu1 %v261_v8 }
  0x58   : > { %273 = vadd.xlane.f32.xlu0 %v253_v9 }
  0x5b   : > { %438 = vmax.xlane.f32.xlu1 %v261_v8 }
  0x5c   : > { %422 = vmax.xlane.f32.xlu0 %v253_v9 }
  0x5f   : > { %291 = vadd.xlane.f32.xlu1 %v262_v10 }
  0x60   : > { %275 = vadd.xlane.f32.xlu0 %v254_v11 }
  0x63   : > { %440 = vmax.xlane.f32.xlu1 %v262_v10 }
  0x64   : > { %424 = vmax.xlane.f32.xlu0 %v254_v11 }
  0x67   : > { %293 = vadd.xlane.f32.xlu1 %v263_v12 }
  0x68   : > { %277 = vadd.xlane.f32.xlu0 %v255_v13 }
  0x6b   : > { %442 = vmax.xlane.f32.xlu1 %v263_v12 }
  0x6c   : > { %426 = vmax.xlane.f32.xlu0 %v255_v13 }
  0x6f   : > { %295 = vadd.xlane.f32.xlu1 %v264_v14 }
  0x70   : > { %279 = vadd.xlane.f32.xlu0 %v256_v15 }
  0x73   : > { %444 = vmax.xlane.f32.xlu1 %v264_v14 }
  0x74   : > { %428 = vmax.xlane.f32.xlu0 %v256_v15 }
  0x77   : > { %297 = vadd.xlane.f32.xlu1 %v265_v16 }
  0x78   : > { %281 = vadd.xlane.f32.xlu0 %v257_v17 }
  0x7b   : > { %446 = vmax.xlane.f32.xlu1 %v265_v16 }
  0x7c   : > { %430 = vmax.xlane.f32.xlu0 %v257_v17 }
  0xcc   : > { %v1290_v18 = vpop.xlane.xlu1 %283 }
  0xcd   : > { %v1292_v19 = vpop.xlane.xlu0 %267  ;;  %v373_v0 = vrot.slane %v1290_v18, %v319_v51 }
  0xce   : > { %v320_v6 = vrot.slane %v1292_v19, %v319_v51 }
  0xd0   : > { %v1294_v20 = vpop.xlane.xlu1 %285 }
  0xd1   : > { %v1296_v21 = vpop.xlane.xlu0 %269  ;;  %v377_v57 = vrot.slane %v1294_v20, %v324_v47 }
  0xd2   : > { %v325_v60 = vrot.slane %v1296_v21, %v324_v47 }
  0xd3   : > { %v378_v10 = vsel %vm326_vm1, %v377_v57, %v373_v0 }
  0xd4   : > { %v1298_v22 = vpop.xlane.xlu1 %418  ;;  %v327_v13 = vsel %vm326_vm1, %v325_v60, %v320_v6 }
  0xd5   : > { %v1300_v23 = vpop.xlane.xlu0 %416  ;;  %v471_v61 = vrot.slane %v1298_v22, %v324_v47 }
  0xd6   : > { %v467_v62 = vrot.slane %v1300_v23, %v319_v51 }
  0xd8   : > { %v1302_v24 = vpop.xlane.xlu1 %434  ;;  %v472_v14 = vsel %vm326_vm1, %v471_v61, %v467_v62 }
  0xd9   : > { %v1304_v25 = vpop.xlane.xlu0 %432  ;;  %v510_v1 = vrot.slane %v1302_v24, %v324_v47 }
  0xda   : > { %v506_v2 = vrot.slane %v1304_v25, %v319_v51 }
  0xdc   : > { %v1306_v26 = vpop.xlane.xlu1 %287  ;;  %v511_v17 = vsel %vm326_vm1, %v510_v1, %v506_v2  ;;  %v415_v2 = vld [vmem:[#allocation3] sm:$0x3] }
  0xdd   : > { %v1308_v27 = vpop.xlane.xlu0 %271  ;;  %v382_v3 = vrot.slane %v1306_v26, %v331_v52 }
  0xde   : > { %v332_v7 = vrot.slane %v1308_v27, %v331_v52 }
  0xdf   : > { %v383_v18 = vsel %vm333_vm2, %v382_v3, %v378_v10 }
  0xe0   : > { %v1310_v28 = vpop.xlane.xlu1 %436  ;;  %v334_v23 = vsel %vm333_vm2, %v332_v7, %v327_v13  ;;  %v566_v7 = vld [vmem:[%s1519_s2 + $0x8] sm:$0xff] (!%p865_p7) }
  0xe1   : > { %v1312_v29 = vpop.xlane.xlu0 %420  ;;  %v515_v8 = vrot.slane %v1310_v28, %v331_v52 }
  0xe2   : > { %v476_v9 = vrot.slane %v1312_v29, %v331_v52 }
  0xe3   : > { %v516_v24 = vsel %vm333_vm2, %v515_v8, %v511_v17  ;;  %v567_v8 = vld [vmem:[%s1519_s2 + $0x10] sm:$0xff] (!%p865_p7)  ;;  %v553_v17 = vld [vmem:[%s1518_s1] sm:$0x3] (!%p865_p7) }
  0xe4   : > { %v1314_v30 = vpop.xlane.xlu1 %289  ;;  %v477_v25 = vsel %vm333_vm2, %v476_v9, %v472_v14  ;;  %v1137_v9 = vmov (!%p865_p7), 0.0|0.0  }
  0xe5   : > { %v1316_v31 = vpop.xlane.xlu0 %273  ;;  %v387_v11 = vrot.slane %v1314_v30, %v1338_v55  ;;  %929 = vmatprep.subr.bf16.mxu0 (!%p865_p7), %v1137_v9 }
  0xe6   : > { %v339_v12 = vrot.slane %v1316_v31, %v1338_v55 }
  0xe7   : > { %v388_v27 = vsel %vm340_vm3, %v387_v11, %v383_v18  ;;  %v568_v11 = vld [vmem:[%s1519_s2 + $0x18] sm:$0xff] (!%p865_p7)  ;;  %v569_v18 = vld [vmem:[%s1519_s2 + $0x20] sm:$0xff] (!%p865_p7) }
  0xe8   : > { %v1318_v32 = vpop.xlane.xlu1 %438  ;;  %v341_v28 = vsel %vm340_vm3, %v339_v12, %v334_v23  ;;  %v1139_v12 = vmov (!%p865_p7), 0.0   ;;  %v933_v14 = vpack.c.bf16 (!%p865_p7), %v568_v11, %v567_v8  ;;  %v572_v23 = vld [vmem:[%s1519_s2 + $0x38] sm:$0xff] (!%p865_p7) }
  0xe9   : > { %v1320_v33 = vpop.xlane.xlu0 %422  ;;  %v520_v15 = vrot.slane %v1318_v32, %v1338_v55  ;;  %909 = vmatprep.mubr.msk.f32.mxu0 (!%p865_p7), %vm1138_vm10, %v1139_v12  ;;  %556 = vst.msk [vmem:[#allocation4] sm:$0xff] (!%p865_p7), %vm555_vm11, %v1139_v12  ;;  %557 = vst.msk [vmem:[#allocation4 + $0x8] sm:$0xff] (!%p865_p7), %vm555_vm11, %v1139_v12  ;;  %918 = vmatprep.subr.mxu1 (!%p865_p7), %v1139_v12 }
  0xea   : > { %v481_v32 = vrot.slane %v1320_v33, %v1338_v55  ;;  %558 = vst.msk [vmem:[#allocation4 + $0x10] sm:$0xff] (!%p865_p7), %vm555_vm11, %v1139_v12  ;;  %920 = vmatprep.mubr.msk.f32.mxu1 (!%p865_p7), %vm1138_vm10, %v1139_v12 }
  0xeb   : > { %v521_v31 = vsel %vm340_vm3, %v520_v15, %v516_v24 }
  0xec   : > { %v1322_v35 = vpop.xlane.xlu1 %291  ;;  %v482_v50 = vsel %vm340_vm3, %v481_v32, %v477_v25 }
  0xed   : > { %v1324_v36 = vpop.xlane.xlu0 %275  ;;  %v392_v16 = vrot.slane %v1322_v35, %v1340_v56 }
  0xee   : > { %v346_v19 = vrot.slane %v1324_v36, %v1340_v56 }
  0xef   : > { %v393_v34 = vsel %vm347_vm4, %v392_v16, %v388_v27 }
  0xf0   : > { %v1326_v38 = vpop.xlane.xlu1 %440  ;;  %v348_v36 = vsel %vm347_vm4, %v346_v19, %v341_v28  ;;  %v570_v19 = vld [vmem:[%s1519_s2 + $0x28] sm:$0xff] (!%p865_p7)  ;;  %v665_v28 = vld [vmem:[%s1520_s3] sm:$0xf] (!%p865_p7) }
  0xf1   : > { %v1328_v39 = vpop.xlane.xlu0 %424  ;;  %v525_v35 = vrot.slane %v1326_v38, %v1340_v56  ;;  %919 = vmatpush3.msk.msra.mxu1 (!%p865_p7), %vm676_vm12, %v665_v28 }
  0xf2   : > { %v486_v37 = vrot.slane %v1328_v39, %v1340_v56 }
  0xf3   : > { %v526_v51 = vsel %vm347_vm4, %v525_v35, %v521_v31 }
  0xf4   : > { %v1330_v43 = vpop.xlane.xlu1 %293 }
  0xf5   : > { %v1332_v44 = vpop.xlane.xlu0 %277  ;;  %v397_v20 = vrot.slane %v1330_v43, %v1343_v58 }
  0xf6   : > { %v353_v26 = vrot.slane %v1332_v44, %v1343_v58 }
  0xf7   : > { %v398_v40 = vsel %vm354_vm5, %v397_v20, %v393_v34 }
  0xf8   : > { %v1334_v53 = vpop.xlane.xlu1 %442  ;;  %v355_v44 = vsel %vm354_vm5, %v353_v26, %v348_v36 }
  0xf9   : > { %v1336_v54 = vpop.xlane.xlu0 %426  ;;  %v530_v41 = vrot.slane %v1334_v53, %v1343_v58 }
  0xfa   : > { %v491_v33 = vrot.slane %v1336_v54, %v1343_v58  ;;  %v487_v54 = vsel %vm347_vm4, %v486_v37, %v482_v50 }
  0xfb   : > { %v531_v55 = vsel %vm354_vm5, %v530_v41, %v526_v51 }
  0xfc   : > { %v296_v4 = vpop.xlane.xlu1 %295 }
  0xfd   : > { %v280_v5 = vpop.xlane.xlu0 %279  ;;  %v402_v29 = vrot.slane %v296_v4, %v1345_v59 }
  0xfe   : > { %v360_v30 = vrot.slane %v280_v5, %v1345_v59 }
  0xff   : > { %v403_v46 = vsel %vm361_vm6, %v402_v29, %v398_v40 }
 0x100   : > { %v445_v21 = vpop.xlane.xlu1 %444  ;;  %v362_v39 = vsel %vm361_vm6, %v360_v30, %v355_v44 }
 0x101   : > { %v429_v22 = vpop.xlane.xlu0 %428  ;;  %v535_v47 = vrot.slane %v445_v21, %v1345_v59  ;;  %v936_v21 = vpack.c.bf16 (!%p865_p7), %v570_v19, %v569_v18 }
 0x102   : > { %v496_v48 = vrot.slane %v429_v22, %v1345_v59  ;;  %v492_v59 = vsel %vm354_vm5, %v491_v33, %v487_v54  ;;  %v571_v22 = vld [vmem:[%s1519_s2 + $0x30] sm:$0xff] (!%p865_p7) }
 0x103   : > { %v536_v0 = vsel %vm361_vm6, %v535_v47, %v531_v55  ;;  %v939_v24 = vpack.c.bf16 (!%p865_p7), %v572_v23, %v571_v22 }
 0x104   : > { %v298_v42 = vpop.xlane.xlu1 %297  ;;  %v497_v1 = vsel %vm361_vm6, %v496_v48, %v492_v59 }
 0x105   : > { %v282_v43 = vpop.xlane.xlu0 %281  ;;  %v407_v45 = vrot.slane %v298_v42, %v1350_v63 }
 0x106   : > { %v367_v38 = vrot.slane %v282_v43, %v1350_v63 }
 0x107   : > { %v408_v52 = vsel %vm368_vm7, %v407_v45, %v403_v46 }
 0x108   : > { %v369_v53 = vsel %vm368_vm7, %v367_v38, %v362_v39  ;;  %v447_v57 = vpop.xlane.xlu1 %446 }
 0x109   : > { %v410_v56 = vsel %vm409_vm8, %v408_v52, %v369_v53  ;;  %v431_v58 = vpop.xlane.xlu0 %430  ;;  %v540_v61 = vrot.slane %v447_v57, %v1350_v63 }
 0x10a   : > { %v412_v60 = vadd.f32 %v410_v56, %v266_v49  ;;  %v501_v62 = vrot.slane %v431_v58, %v1350_v63  ;;  %549 = sbr.rel (%p865_p7) target bundleno = 755 (0x2f3), region = 48  ;;  %v565_v63 = vld [vmem:[%s1519_s2] sm:$0xff] (!%p865_p7) }
 0x10b   : > { %v541_v3 = vsel %vm368_vm7, %v540_v61, %v536_v0  ;;  %v930_v10 = vpack.c.bf16 (!%p865_p7), %v566_v7, %v565_v63 }
 0x10c   : > { %414 = vst.msk [vmem:[#allocation2] sm:$0x3] %vm413_vm9, %v412_v60  ;;  %v502_v4 = vsel %vm368_vm7, %v501_v62, %v497_v1 }
 0x10d   : > { %v542_v5 = vsel %vm409_vm8, %v541_v3, %v502_v4  ;;  %931 = vmatpush3.bf16.msra.mxu0 (!%p865_p7), %v930_v10 }
 0x10e   : > { %v544_v6 = vmax.f32 %v415_v2, %v542_v5  ;;  %932 = vmatprep.subr.bf16.mxu0 (!%p865_p7), %v1137_v9 }
 0x110   : > { %545 = vst.msk [vmem:[#allocation3] sm:$0x3] %vm413_vm9, %v544_v6 }
 0x111   : > { %934 = vmatpush3.bf16.msra.mxu0 %v933_v14 }
 0x112   : > { %935 = vmatprep.subr.bf16.mxu0 %v1137_v9 }
 0x113   : > { %v550_v13 = vld [vmem:[#allocation2] sm:$0x3] }
 0x114   : > { %v551_v15 = vmul.f32 0.00390625, %v550_v13 }
 0x115   : > { %937 = vmatpush3.bf16.msra.mxu0 %v936_v21 }
 0x116   : > { %v554_v20 = vmul.f32 %v553_v17, %v551_v15  ;;  %559 = vst.msk [vmem:[#allocation4] sm:$0x3] %vm413_vm9, %v551_v15  ;;  %938 = vmatprep.subr.bf16.mxu0 %v1137_v9 }
 0x117   : > { %v552_v16 = vld [vmem:[#allocation3] sm:$0x3] }
 0x118   : > { %560 = vst.msk [vmem:[#allocation4 + $0x8] sm:$0x3] %vm413_vm9, %v552_v16  ;;  %561 = vst.msk [vmem:[#allocation4 + $0x10] sm:$0x3] %vm413_vm9, %v554_v20 }
 0x119   : > { %940 = vmatpush3.bf16.msra.mxu0 %v939_v24 }
 0x11d   : > { %v562_v25 = vld [vmem:[#allocation4] sm:$0xff] }
 0x11e   : > { %910 = vmatmul.mubr.msk.f32.vlgmr.msra.gmra.mrb[0].mxu0 %vm555_vm11, %v562_v25 }
 0x11f   : > { %912 = vmatprep.mubr.msk.f32.mxu0 %vm1138_vm10, %v1139_v12  ;;  %v563_v26 = vld [vmem:[#allocation4 + $0x8] sm:$0xff]  ;;  %v564_v27 = vld [vmem:[#allocation4 + $0x10] sm:$0xff] }
 0x122   : > { %913 = vmatmul.mubr.msk.f32.gmra.mrb[2].mxu0 %vm555_vm11, %v563_v26 }
 0x123   : > { %915 = vmatprep.mubr.msk.f32.mxu0 %vm1138_vm10, %v1139_v12 }
 0x126   : > { %916 = vmatmul.mubr.msk.f32.gmra.mrb[4].mxu0 %vm555_vm11, %v564_v27 }
 0x1f1   : > { %v648_v29 = vpop.f32.mrb[0].mxu0 }
 0x1f2   : > { %v662_v30 = vmax.f32 %v648_v29, 0.0  ;;  %v911_v31 = vpop.f32.mrb[1].mxu0 }
 0x1f4   : > { %921 = vmatmul.mubr.msk.f32.vlgmr.msra.gmra.mrb[0].mxu1 %vm666_vm13, %v662_v30 }
 0x1f5   : > { %v653_v32 = vpop.f32.mrb[2].mxu0  ;;  %923 = vmatprep.mubr.msk.f32.mxu1 %vm1138_vm10, %v1139_v12 }
 0x1f6   : > { %v914_v34 = vpop.f32.mrb[3].mxu0  ;;  %v663_v35 = vmax.f32 %v653_v32, 0.0 }
 0x1f9   : > { %v658_v36 = vpop.f32.mrb[4].mxu0 }
 0x1fa   : > { %v917_v37 = vpop.f32.mrb[5].mxu0  ;;  %v664_v40 = vmax.f32 %v658_v36, 0.0 }
 0x1fc   : > { %924 = vmatmul.mubr.msk.f32.gmra.mrb[0].mxu1 %vm666_vm13, %v663_v35 }
 0x1fd   : > { %926 = vmatprep.mubr.msk.f32.mxu1 %vm1138_vm10, %v1139_v12 }
 0x204   : > { %927 = vmatmul.mubr.msk.f32.gmra.mrb[0].mxu1 %vm666_vm13, %v664_v40 }
 0x2d7   : > { %v756_v41 = vpop.f32.mrb[0].mxu1 }
 0x2d8   : > { %v873_v42 = vmul.f32 -1.442695, %v756_v41  ;;  %v928_v43 = vpop.f32.mrb[1].mxu1 }
 0x2da   : > { %1015 = vpow2.f32 %v873_v42 }
 0x2e4   : > { %v1016_v44 = vpop.eup %1015 }
 0x2e5   : > { %v765_v33 = vadd.f32 1.0, %v1016_v44 }
 0x2e7   : > { %1017 = vrcp.f32 %v765_v33 }
 0x2f1   : > { %v1018_v45 = vpop.eup %1017 }
 0x2f2   : > { %768 = vst.msk [vmem:[#allocation8] sm:$0x3] %vm413_vm9, %v1018_v45 }
 0x2f3 PF: > { %p1473_p9 = scmp.eq.s32.totalorder %s856_s21, 1  ;;  %s1140_s9 = smov [#allocation8]  }
 0x2f4   : > { %s778_s10 = sshll.u32 %s1140_s9, 4  ;;  %s779_s10 = int_to_ptr.vmem [resolvable:$true] %s778_s10 }
 0x2f5   : > { %s1049_s11 = scalar_lea.vmem %s779_s10, 32  ;;  %p1056_p11 = scmp.lt.s32.totalorder %s779_s10, %s779_s10 }
 0x2f6   : > { %p1050_p5 = scmp.ne.s32.totalorder %s779_s10, %s1049_s11  ;;  %p1057_p13 = scmp.lt.s32.totalorder %s1049_s11, %s1049_s11 }
 0x2f8   : > { %p1051_p6 = pnand %p1050_p5, %p1473_p9  ;;  %p1058_p1 = por %p1057_p13, %p1056_p11 }
 0x2fa   : > { %p1052_p8 = pneg %p1051_p6 }
 0x2fc   : > { %p1059_p2 = pnand %p1058_p1, %p1052_p8 }
 0x2fe   : > { %1062 = shalt.err (!%p1059_p2)
}
 0x2ff   : > { %s1063_s21 = scalar_lea.hbm %s1521_s4, 32 }
 0x300   : > { %p1064_p3 = scmp.ne.s32.totalorder %s1521_s4, %s1063_s21  ;;  %p1069_p4 = scmp.lt.u32.totalorder %s1063_s21, %s1521_s4 }
 0x302   : > { %p1065_p12 = pnand %p1064_p3, %p1473_p9 }
 0x304   : > { %p1066_p0 = pneg %p1065_p12 }
 0x306   : > { %p1071_p10 = pnand %p1069_p4, %p1066_p0 }
 0x308   : > { %1074 = shalt.err (!%p1071_p10)
}
 0x309   : > { %948 = dma.vmem_to_hbm [thread:$0]  (%p1473_p9), %s779_s10, 32, %s1521_s4, [#allocation7]  }
 0x30a   : > { %1104 = dma.done.wait (%p1473_p9), [#allocation7], 32  }
 0x30b   : > { %1106 = vsyncadd (%p1473_p9), [#allocation7], 4294967264 }
 0x30c PF: > { %s18_s20 = sadd.s32 1, %s1129_s20   ;;  %s1527_s15 = smov %s1113_s16 }
 0x30d   : > { %p15_p7 = scmp.ge.s32.totalorder %s18_s20, 4   ;;  %s1528_s16 = smov %s1117_s17 }
 0x30e   : > { %s1529_s17 = smov %s1217_s27  ;;  %s1530_s18 = smov %s1125_s19 }
 0x30f   : > { %s1531_s19 = smov %s1533_s22  ;;  %17 = sbr.rel (!%p15_p7) target bundleno = 5 (0x5), region = 85 }
 0x316   :  { %791 = vsyncpa [#allocation6], 1 }
 0x317   :  { %793 = vsyncpa [#allocation6 + $0x1], 1 }
 0x318   :  { %794 = vsyncpa [#allocation7], 1 }
 0x319   :  { %796 = vsyncpa [#allocation7 + $0x1], 1 }

</bundles_post_ra>
